<compile_context>
chip_gen: v7x
topology: tpu7x:2x2x1
jax: 0.10.0
libtpu: 0.0.40
codegen_flags: <defaults>
</compile_context>

<pallas_src>
import functools
import math

import jax
import jax.numpy as jnp
from jax.experimental import pallas as pl
from jax.experimental.pallas import tpu as pltpu


# ----------------------------- Pallas conv kernel ---------------------------

def _conv_taps_kernel(xp_ref, w_ref, b_ref, o_ref, *, kh, kw, th, w_out, cin):
    """One (batch, row-tile, cout-tile) step of a stride-1 'same' conv.

    xp_ref: (1, Hp, Wp, Cin)    padded input (bf16), full padded image
    w_ref : (kh*kw*Cin, tn)     weights (bf16), rows ordered (ky, kx, ci)
    b_ref : (1, tn)             bias (f32)
    o_ref : (1, th*w_out, tn)   output rows for this tile (h-major, w-minor)
    """
    r = pl.program_id(1)
    tn = o_ref.shape[-1]
    row0 = pl.multiple_of(r * th, th)

    # Row-tile + halo slab; upcast once to f32 so the static tap-window slices
    # below stay on plain f32 layouts.
    xs = xp_ref[0, pl.ds(row0, th + kh - 1), :, :].astype(jnp.float32)

    acc = jnp.zeros((th * w_out, tn), jnp.float32)
    for ky in range(kh):
        for kx in range(kw):
            a = xs[ky:ky + th, kx:kx + w_out, :].reshape(th * w_out, cin)
            t = ky * kw + kx
            wt = w_ref[t * cin:(t + 1) * cin, :]            # (cin, tn) bf16
            acc = acc + jnp.dot(a.astype(jnp.bfloat16), wt,
                                preferred_element_type=jnp.float32)

    o_ref[0] = (acc + b_ref[...]).astype(o_ref.dtype)


def _pick_row_tile(h, w):
    """Largest row tile whose (rows x cout) output slab stays modest."""
    max_out_rows = 2048
    if h * w <= max_out_rows:
        return h
    th = h
    for cand in range(h - 1, 0, -1):
        if h % cand == 0 and cand * w <= max_out_rows and (cand * w) % 8 == 0:
            th = cand
            break
    return th


def conv2d_same_pallas(x_nhwc, w_oihw, bias, *, out_dtype=jnp.float32):
    """Stride-1, symmetric-'same'-padding Conv2d on NHWC activations."""
    n, h, w, cin = x_nhwc.shape
    cout, cin2, kh, kw = w_oihw.shape
    assert cin == cin2 and kh % 2 == 1 and kw % 2 == 1
    ph, pw = kh // 2, kw // 2

    xp = jnp.pad(x_nhwc, ((0, 0), (ph, ph), (pw, pw), (0, 0))).astype(jnp.bfloat16)
    hp, wp = h + 2 * ph, w + 2 * pw

    # Weight matrix rows ordered (ky, kx, ci) -> matches in-kernel tap slices.
    wm = jnp.transpose(w_oihw, (2, 3, 1, 0)).reshape(kh * kw * cin, cout)
    wm = wm.astype(jnp.bfloat16)
    b2 = bias.reshape(1, cout).astype(jnp.float32)

    if cout % 256 == 0:
        tn = 256
    elif cout % 128 == 0:
        tn = 128
    else:
        tn = cout
    th = _pick_row_tile(h, w)
    grid = (n, h // th, cout // tn)

    kernel = functools.partial(_conv_taps_kernel,
                               kh=kh, kw=kw, th=th, w_out=w, cin=cin)

    out = pl.pallas_call(
        kernel,
        out_shape=jax.ShapeDtypeStruct((n, h * w, cout), out_dtype),
        grid=grid,
        in_specs=[
            pl.BlockSpec((1, hp, wp, cin), lambda nb, r, j: (nb, 0, 0, 0)),
            pl.BlockSpec((kh * kw * cin, tn), lambda nb, r, j: (0, j)),
            pl.BlockSpec((1, tn), lambda nb, r, j: (0, j)),
        ],
        out_specs=pl.BlockSpec((1, th * w, tn), lambda nb, r, j: (nb, r, j)),
        compiler_params=pltpu.CompilerParams(
            dimension_semantics=("parallel", "parallel", "parallel")),
    )(xp, wm, b2)

    return out.reshape(n, h, w, cout)


# ------------------------------- layout glue ---------------------------------

def _space_to_depth_nhwc(x, r):
    """Matches F.unfold(kernel=r, stride=r).view(b, c*r*r, h//r, w//r):
    output channel ordering is (c, ky, kx)."""
    n, h, w, c = x.shape
    x = x.reshape(n, h // r, r, w // r, r, c)
    x = jnp.transpose(x, (0, 1, 3, 5, 2, 4))
    return x.reshape(n, h // r, w // r, c * r * r)


# ------------------------------- forward pass --------------------------------

def space2depth_forward(params, x_nchw):
    x = jnp.transpose(x_nchw, (0, 2, 3, 1)).astype(jnp.float32)   # NHWC
    x = _space_to_depth_nhwc(x, 2)                                # (N,H/2,W/2,4C)
    x = conv2d_same_pallas(x, params["w1"], params["b1"],
                           out_dtype=jnp.bfloat16)                # intermediate bf16
    x = conv2d_same_pallas(x, params["w2"], params["b2"],
                           out_dtype=jnp.float32)
    return jnp.transpose(x, (0, 3, 1, 2))                         # NCHW


# ---------------------------- pure-JAX reference ------------------------------

def _reference_forward(params, x_nchw):
    b, c, h, w = x_nchw.shape
    u = x_nchw.reshape(b, c, h // 2, 2, w // 2, 2)
    u = jnp.transpose(u, (0, 1, 3, 5, 2, 4)).reshape(b, c * 4, h // 2, w // 2)

    def conv(z, wgt, bb):
        out = jax.lax.conv_general_dilated(
            z, wgt, window_strides=(1, 1), padding="SAME",
            dimension_numbers=("NCHW", "OIHW", "NCHW"),
            precision=jax.lax.Precision.HIGHEST)
        return out + bb[None, :, None, None]

    return conv(conv(u, params["w1"], params["b1"]), params["w2"], params["b2"])


# ----------------------------------- main -------------------------------------

if __name__ == "__main__":
    B, C, H, W = 2, 4, 16, 16
    in_channels = C * 4          # Space2Depth requires in_channels == 4 * input C
    mid_channels = 32
    out_channels = 16

    key = jax.random.PRNGKey(0)
    k1, k2, k3, k4, k5 = jax.random.split(key, 5)

    def _uinit(k, shape, fan_in):
        bound = 1.0 / math.sqrt(fan_in)
        return jax.random.uniform(k, shape, jnp.float32, -bound, bound)

    params = dict(
        w1=_uinit(k1, (mid_channels, in_channels, 3, 3), in_channels * 9),
        b1=_uinit(k2, (mid_channels,), in_channels * 9),
        w2=_uinit(k3, (out_channels, mid_channels, 3, 3), mid_channels * 9),
        b2=_uinit(k4, (out_channels,), mid_channels * 9),
    )
    x = jax.random.normal(k5, (B, C, H, W), jnp.float32)

    fwd = jax.jit(space2depth_forward)
    y = jax.block_until_ready(fwd(params, x))

    assert y.shape == (B, out_channels, H // 2, W // 2), y.shape
    assert y.dtype == jnp.float32
    assert bool(jnp.isfinite(y).all())

    ref = jax.block_until_ready(_reference_forward(params, x))
    max_err = float(jnp.max(jnp.abs(y - ref)))
    assert max_err < 5e-2, f"max abs error vs reference: {max_err}"

    print("KERNEL_OK")
</pallas_src>

<mosaic_0001>
module attributes {stable_mosaic.version = 11 : i64} {
  func.func @_conv_taps_kernel(%arg0: i32, %arg1: i32, %arg2: i32, %arg3: memref<1x10x10x16xbf16, #tpu.memory_space<vmem>>, %arg4: memref<144x32xbf16, #tpu.memory_space<vmem>>, %arg5: memref<1x32xf32, #tpu.memory_space<vmem>>, %arg6: memref<1x64x32xbf16, #tpu.memory_space<vmem>>) attributes {dimension_semantics = [#tpu.dimension_semantics<parallel>, #tpu.dimension_semantics<parallel>, #tpu.dimension_semantics<parallel>], iteration_bounds = array<i64: 2, 1, 1>, scalar_prefetch = 0 : i64, scratch_operands = 0 : i64, tpu.core_type = #tpu.core_type<tc>, window_params = [{transform_indices = @transform_0, window_bounds = array<i64: 1, 10, 10, 16>}, {transform_indices = @transform_1, window_bounds = array<i64: 144, 32>}, {transform_indices = @transform_2, window_bounds = array<i64: 1, 32>}, {transform_indices = @transform_3, window_bounds = array<i64: 1, 64, 32>}]} {
    %c8_i32 = arith.constant 8 : i32
    %0 = arith.muli %arg1, %c8_i32 : i32
    %1 = tpu.assume_multiple %0, 8 : i32
    %c0 = arith.constant 0 : index
    %2 = arith.index_cast %1 : i32 to index
    %c0_0 = arith.constant 0 : index
    %c0_1 = arith.constant 0 : index
    %3 = vector.load %arg3[%c0, %2, %c0_0, %c0_1] : memref<1x10x10x16xbf16, #tpu.memory_space<vmem>>, vector<1x10x10x16xbf16>
    %4 = vector.shape_cast %3 : vector<1x10x10x16xbf16> to vector<10x10x16xbf16>
    %5 = arith.extf %4 : vector<10x10x16xbf16> to vector<10x10x16xf32>
    %cst = arith.constant 0.000000e+00 : f32
    %6 = vector.broadcast %cst : f32 to vector<64x32xf32>
    %7 = vector.extract_strided_slice %5 {offsets = [0, 0, 0], sizes = [8, 8, 16], strides = [1, 1, 1]} : vector<10x10x16xf32> to vector<8x8x16xf32>
    %8 = vector.shape_cast %7 : vector<8x8x16xf32> to vector<64x16xf32>
    %c0_2 = arith.constant 0 : index
    %c0_3 = arith.constant 0 : index
    %9 = vector.load %arg4[%c0_2, %c0_3] : memref<144x32xbf16, #tpu.memory_space<vmem>>, vector<16x32xbf16>
    %10 = arith.truncf %8 : vector<64x16xf32> to vector<64x16xbf16>
    %cst_4 = arith.constant dense<0.000000e+00> : vector<64x32xf32>
    %11 = tpu.matmul %10, %9, %cst_4 {dimension_numbers = #tpu.dot_dimension_numbers<[1], [0], [0], [1], [0, 0, 1, 1], [], []>} : vector<64x16xbf16>, vector<16x32xbf16>, vector<64x32xf32> -> vector<64x32xf32>
    %12 = arith.addf %6, %11 : vector<64x32xf32>
    %13 = vector.extract_strided_slice %5 {offsets = [0, 1, 0], sizes = [8, 8, 16], strides = [1, 1, 1]} : vector<10x10x16xf32> to vector<8x8x16xf32>
    %14 = vector.shape_cast %13 : vector<8x8x16xf32> to vector<64x16xf32>
    %c16 = arith.constant 16 : index
    %c0_5 = arith.constant 0 : index
    %15 = vector.load %arg4[%c16, %c0_5] : memref<144x32xbf16, #tpu.memory_space<vmem>>, vector<16x32xbf16>
    %16 = arith.truncf %14 : vector<64x16xf32> to vector<64x16xbf16>
    %cst_6 = arith.constant dense<0.000000e+00> : vector<64x32xf32>
    %17 = tpu.matmul %16, %15, %cst_6 {dimension_numbers = #tpu.dot_dimension_numbers<[1], [0], [0], [1], [0, 0, 1, 1], [], []>} : vector<64x16xbf16>, vector<16x32xbf16>, vector<64x32xf32> -> vector<64x32xf32>
    %18 = arith.addf %12, %17 : vector<64x32xf32>
    %19 = vector.extract_strided_slice %5 {offsets = [0, 2, 0], sizes = [8, 8, 16], strides = [1, 1, 1]} : vector<10x10x16xf32> to vector<8x8x16xf32>
    %20 = vector.shape_cast %19 : vector<8x8x16xf32> to vector<64x16xf32>
    %c32 = arith.constant 32 : index
    %c0_7 = arith.constant 0 : index
    %21 = vector.load %arg4[%c32, %c0_7] : memref<144x32xbf16, #tpu.memory_space<vmem>>, vector<16x32xbf16>
    %22 = arith.truncf %20 : vector<64x16xf32> to vector<64x16xbf16>
    %cst_8 = arith.constant dense<0.000000e+00> : vector<64x32xf32>
    %23 = tpu.matmul %22, %21, %cst_8 {dimension_numbers = #tpu.dot_dimension_numbers<[1], [0], [0], [1], [0, 0, 1, 1], [], []>} : vector<64x16xbf16>, vector<16x32xbf16>, vector<64x32xf32> -> vector<64x32xf32>
    %24 = arith.addf %18, %23 : vector<64x32xf32>
    %25 = vector.extract_strided_slice %5 {offsets = [1, 0, 0], sizes = [8, 8, 16], strides = [1, 1, 1]} : vector<10x10x16xf32> to vector<8x8x16xf32>
    %26 = vector.shape_cast %25 : vector<8x8x16xf32> to vector<64x16xf32>
    %c48 = arith.constant 48 : index
    %c0_9 = arith.constant 0 : index
    %27 = vector.load %arg4[%c48, %c0_9] : memref<144x32xbf16, #tpu.memory_space<vmem>>, vector<16x32xbf16>
    %28 = arith.truncf %26 : vector<64x16xf32> to vector<64x16xbf16>
    %cst_10 = arith.constant dense<0.000000e+00> : vector<64x32xf32>
    %29 = tpu.matmul %28, %27, %cst_10 {dimension_numbers = #tpu.dot_dimension_numbers<[1], [0], [0], [1], [0, 0, 1, 1], [], []>} : vector<64x16xbf16>, vector<16x32xbf16>, vector<64x32xf32> -> vector<64x32xf32>
    %30 = arith.addf %24, %29 : vector<64x32xf32>
    %31 = vector.extract_strided_slice %5 {offsets = [1, 1, 0], sizes = [8, 8, 16], strides = [1, 1, 1]} : vector<10x10x16xf32> to vector<8x8x16xf32>
    %32 = vector.shape_cast %31 : vector<8x8x16xf32> to vector<64x16xf32>
    %c64 = arith.constant 64 : index
    %c0_11 = arith.constant 0 : index
    %33 = vector.load %arg4[%c64, %c0_11] : memref<144x32xbf16, #tpu.memory_space<vmem>>, vector<16x32xbf16>
    %34 = arith.truncf %32 : vector<64x16xf32> to vector<64x16xbf16>
    %cst_12 = arith.constant dense<0.000000e+00> : vector<64x32xf32>
    %35 = tpu.matmul %34, %33, %cst_12 {dimension_numbers = #tpu.dot_dimension_numbers<[1], [0], [0], [1], [0, 0, 1, 1], [], []>} : vector<64x16xbf16>, vector<16x32xbf16>, vector<64x32xf32> -> vector<64x32xf32>
    %36 = arith.addf %30, %35 : vector<64x32xf32>
    %37 = vector.extract_strided_slice %5 {offsets = [1, 2, 0], sizes = [8, 8, 16], strides = [1, 1, 1]} : vector<10x10x16xf32> to vector<8x8x16xf32>
    %38 = vector.shape_cast %37 : vector<8x8x16xf32> to vector<64x16xf32>
    %c80 = arith.constant 80 : index
    %c0_13 = arith.constant 0 : index
    %39 = vector.load %arg4[%c80, %c0_13] : memref<144x32xbf16, #tpu.memory_space<vmem>>, vector<16x32xbf16>
    %40 = arith.truncf %38 : vector<64x16xf32> to vector<64x16xbf16>
    %cst_14 = arith.constant dense<0.000000e+00> : vector<64x32xf32>
    %41 = tpu.matmul %40, %39, %cst_14 {dimension_numbers = #tpu.dot_dimension_numbers<[1], [0], [0], [1], [0, 0, 1, 1], [], []>} : vector<64x16xbf16>, vector<16x32xbf16>, vector<64x32xf32> -> vector<64x32xf32>
    %42 = arith.addf %36, %41 : vector<64x32xf32>
    %43 = vector.extract_strided_slice %5 {offsets = [2, 0, 0], sizes = [8, 8, 16], strides = [1, 1, 1]} : vector<10x10x16xf32> to vector<8x8x16xf32>
    %44 = vector.shape_cast %43 : vector<8x8x16xf32> to vector<64x16xf32>
    %c96 = arith.constant 96 : index
    %c0_15 = arith.constant 0 : index
    %45 = vector.load %arg4[%c96, %c0_15] : memref<144x32xbf16, #tpu.memory_space<vmem>>, vector<16x32xbf16>
    %46 = arith.truncf %44 : vector<64x16xf32> to vector<64x16xbf16>
    %cst_16 = arith.constant dense<0.000000e+00> : vector<64x32xf32>
    %47 = tpu.matmul %46, %45, %cst_16 {dimension_numbers = #tpu.dot_dimension_numbers<[1], [0], [0], [1], [0, 0, 1, 1], [], []>} : vector<64x16xbf16>, vector<16x32xbf16>, vector<64x32xf32> -> vector<64x32xf32>
    %48 = arith.addf %42, %47 : vector<64x32xf32>
    %49 = vector.extract_strided_slice %5 {offsets = [2, 1, 0], sizes = [8, 8, 16], strides = [1, 1, 1]} : vector<10x10x16xf32> to vector<8x8x16xf32>
    %50 = vector.shape_cast %49 : vector<8x8x16xf32> to vector<64x16xf32>
    %c112 = arith.constant 112 : index
    %c0_17 = arith.constant 0 : index
    %51 = vector.load %arg4[%c112, %c0_17] : memref<144x32xbf16, #tpu.memory_space<vmem>>, vector<16x32xbf16>
    %52 = arith.truncf %50 : vector<64x16xf32> to vector<64x16xbf16>
    %cst_18 = arith.constant dense<0.000000e+00> : vector<64x32xf32>
    %53 = tpu.matmul %52, %51, %cst_18 {dimension_numbers = #tpu.dot_dimension_numbers<[1], [0], [0], [1], [0, 0, 1, 1], [], []>} : vector<64x16xbf16>, vector<16x32xbf16>, vector<64x32xf32> -> vector<64x32xf32>
    %54 = arith.addf %48, %53 : vector<64x32xf32>
    %55 = vector.extract_strided_slice %5 {offsets = [2, 2, 0], sizes = [8, 8, 16], strides = [1, 1, 1]} : vector<10x10x16xf32> to vector<8x8x16xf32>
    %56 = vector.shape_cast %55 : vector<8x8x16xf32> to vector<64x16xf32>
    %c128 = arith.constant 128 : index
    %c0_19 = arith.constant 0 : index
    %57 = vector.load %arg4[%c128, %c0_19] : memref<144x32xbf16, #tpu.memory_space<vmem>>, vector<16x32xbf16>
    %58 = arith.truncf %56 : vector<64x16xf32> to vector<64x16xbf16>
    %cst_20 = arith.constant dense<0.000000e+00> : vector<64x32xf32>
    %59 = tpu.matmul %58, %57, %cst_20 {dimension_numbers = #tpu.dot_dimension_numbers<[1], [0], [0], [1], [0, 0, 1, 1], [], []>} : vector<64x16xbf16>, vector<16x32xbf16>, vector<64x32xf32> -> vector<64x32xf32>
    %60 = arith.addf %54, %59 : vector<64x32xf32>
    %c0_21 = arith.constant 0 : index
    %c0_22 = arith.constant 0 : index
    %61 = vector.load %arg5[%c0_21, %c0_22] : memref<1x32xf32, #tpu.memory_space<vmem>>, vector<1x32xf32>
    %62 = vector.broadcast %61 : vector<1x32xf32> to vector<64x32xf32>
    %63 = arith.addf %60, %62 : vector<64x32xf32>
    %64 = arith.truncf %63 : vector<64x32xf32> to vector<64x32xbf16>
    %c0_23 = arith.constant 0 : index
    %c0_24 = arith.constant 0 : index
    %c0_25 = arith.constant 0 : index
    %65 = vector.load %arg6[%c0_23, %c0_24, %c0_25] : memref<1x64x32xbf16, #tpu.memory_space<vmem>>, vector<1x64x32xbf16>
    %66 = vector.shape_cast %65 : vector<1x64x32xbf16> to vector<64x32xbf16>
    %67 = vector.shape_cast %64 : vector<64x32xbf16> to vector<1x64x32xbf16>
    tpu.vector_store %arg6[%c0_23, %c0_24, %c0_25], %67 {strides = array<i32>} : memref<1x64x32xbf16, #tpu.memory_space<vmem>>, vector<1x64x32xbf16>,
    return
  }
  func.func @transform_0(%arg0: i32, %arg1: i32, %arg2: i32) -> (i32, i32, i32, i32) {
    %c0_i32 = arith.constant 0 : i32
    %c0_i32_0 = arith.constant 0 : i32
    %c0_i32_1 = arith.constant 0 : i32
    %c0_i32_2 = arith.constant 0 : i32
    return %arg0, %c0_i32, %c0_i32_0, %c0_i32_1 : i32, i32, i32, i32
  }
  func.func @transform_1(%arg0: i32, %arg1: i32, %arg2: i32) -> (i32, i32) {
    %c0_i32 = arith.constant 0 : i32
    %c0_i32_0 = arith.constant 0 : i32
    return %c0_i32, %arg2 : i32, i32
  }
  func.func @transform_2(%arg0: i32, %arg1: i32, %arg2: i32) -> (i32, i32) {
    %c0_i32 = arith.constant 0 : i32
    %c0_i32_0 = arith.constant 0 : i32
    return %c0_i32, %arg2 : i32, i32
  }
  func.func @transform_3(%arg0: i32, %arg1: i32, %arg2: i32) -> (i32, i32, i32) {
    %c0_i32 = arith.constant 0 : i32
    return %arg0, %arg1, %arg2 : i32, i32, i32
  }
}

module attributes {stable_mosaic.version = 11 : i64} {
  func.func @_conv_taps_kernel(%arg0: i32, %arg1: i32, %arg2: i32, %arg3: memref<1x10x10x32xbf16, #tpu.memory_space<vmem>>, %arg4: memref<288x16xbf16, #tpu.memory_space<vmem>>, %arg5: memref<1x16xf32, #tpu.memory_space<vmem>>, %arg6: memref<1x64x16xf32, #tpu.memory_space<vmem>>) attributes {dimension_semantics = [#tpu.dimension_semantics<parallel>, #tpu.dimension_semantics<parallel>, #tpu.dimension_semantics<parallel>], iteration_bounds = array<i64: 2, 1, 1>, scalar_prefetch = 0 : i64, scratch_operands = 0 : i64, tpu.core_type = #tpu.core_type<tc>, window_params = [{transform_indices = @transform_0, window_bounds = array<i64: 1, 10, 10, 32>}, {transform_indices = @transform_1, window_bounds = array<i64: 288, 16>}, {transform_indices = @transform_2, window_bounds = array<i64: 1, 16>}, {transform_indices = @transform_3, window_bounds = array<i64: 1, 64, 16>}]} {
    %c8_i32 = arith.constant 8 : i32
    %0 = arith.muli %arg1, %c8_i32 : i32
    %1 = tpu.assume_multiple %0, 8 : i32
    %c0 = arith.constant 0 : index
    %2 = arith.index_cast %1 : i32 to index
    %c0_0 = arith.constant 0 : index
    %c0_1 = arith.constant 0 : index
    %3 = vector.load %arg3[%c0, %2, %c0_0, %c0_1] : memref<1x10x10x32xbf16, #tpu.memory_space<vmem>>, vector<1x10x10x32xbf16>
    %4 = vector.shape_cast %3 : vector<1x10x10x32xbf16> to vector<10x10x32xbf16>
    %5 = arith.extf %4 : vector<10x10x32xbf16> to vector<10x10x32xf32>
    %cst = arith.constant 0.000000e+00 : f32
    %6 = vector.broadcast %cst : f32 to vector<64x16xf32>
    %7 = vector.extract_strided_slice %5 {offsets = [0, 0, 0], sizes = [8, 8, 32], strides = [1, 1, 1]} : vector<10x10x32xf32> to vector<8x8x32xf32>
    %8 = vector.shape_cast %7 : vector<8x8x32xf32> to vector<64x32xf32>
    %c0_2 = arith.constant 0 : index
    %c0_3 = arith.constant 0 : index
    %9 = vector.load %arg4[%c0_2, %c0_3] : memref<288x16xbf16, #tpu.memory_space<vmem>>, vector<32x16xbf16>
    %10 = arith.truncf %8 : vector<64x32xf32> to vector<64x32xbf16>
    %cst_4 = arith.constant dense<0.000000e+00> : vector<64x16xf32>
    %11 = tpu.matmul %10, %9, %cst_4 {dimension_numbers = #tpu.dot_dimension_numbers<[1], [0], [0], [1], [0, 0, 1, 1], [], []>} : vector<64x32xbf16>, vector<32x16xbf16>, vector<64x16xf32> -> vector<64x16xf32>
    %12 = arith.addf %6, %11 : vector<64x16xf32>
    %13 = vector.extract_strided_slice %5 {offsets = [0, 1, 0], sizes = [8, 8, 32], strides = [1, 1, 1]} : vector<10x10x32xf32> to vector<8x8x32xf32>
    %14 = vector.shape_cast %13 : vector<8x8x32xf32> to vector<64x32xf32>
    %c32 = arith.constant 32 : index
    %c0_5 = arith.constant 0 : index
    %15 = vector.load %arg4[%c32, %c0_5] : memref<288x16xbf16, #tpu.memory_space<vmem>>, vector<32x16xbf16>
    %16 = arith.truncf %14 : vector<64x32xf32> to vector<64x32xbf16>
    %cst_6 = arith.constant dense<0.000000e+00> : vector<64x16xf32>
    %17 = tpu.matmul %16, %15, %cst_6 {dimension_numbers = #tpu.dot_dimension_numbers<[1], [0], [0], [1], [0, 0, 1, 1], [], []>} : vector<64x32xbf16>, vector<32x16xbf16>, vector<64x16xf32> -> vector<64x16xf32>
    %18 = arith.addf %12, %17 : vector<64x16xf32>
    %19 = vector.extract_strided_slice %5 {offsets = [0, 2, 0], sizes = [8, 8, 32], strides = [1, 1, 1]} : vector<10x10x32xf32> to vector<8x8x32xf32>
    %20 = vector.shape_cast %19 : vector<8x8x32xf32> to vector<64x32xf32>
    %c64 = arith.constant 64 : index
    %c0_7 = arith.constant 0 : index
    %21 = vector.load %arg4[%c64, %c0_7] : memref<288x16xbf16, #tpu.memory_space<vmem>>, vector<32x16xbf16>
    %22 = arith.truncf %20 : vector<64x32xf32> to vector<64x32xbf16>
    %cst_8 = arith.constant dense<0.000000e+00> : vector<64x16xf32>
    %23 = tpu.matmul %22, %21, %cst_8 {dimension_numbers = #tpu.dot_dimension_numbers<[1], [0], [0], [1], [0, 0, 1, 1], [], []>} : vector<64x32xbf16>, vector<32x16xbf16>, vector<64x16xf32> -> vector<64x16xf32>
    %24 = arith.addf %18, %23 : vector<64x16xf32>
    %25 = vector.extract_strided_slice %5 {offsets = [1, 0, 0], sizes = [8, 8, 32], strides = [1, 1, 1]} : vector<10x10x32xf32> to vector<8x8x32xf32>
    %26 = vector.shape_cast %25 : vector<8x8x32xf32> to vector<64x32xf32>
    %c96 = arith.constant 96 : index
    %c0_9 = arith.constant 0 : index
    %27 = vector.load %arg4[%c96, %c0_9] : memref<288x16xbf16, #tpu.memory_space<vmem>>, vector<32x16xbf16>
    %28 = arith.truncf %26 : vector<64x32xf32> to vector<64x32xbf16>
    %cst_10 = arith.constant dense<0.000000e+00> : vector<64x16xf32>
    %29 = tpu.matmul %28, %27, %cst_10 {dimension_numbers = #tpu.dot_dimension_numbers<[1], [0], [0], [1], [0, 0, 1, 1], [], []>} : vector<64x32xbf16>, vector<32x16xbf16>, vector<64x16xf32> -> vector<64x16xf32>
    %30 = arith.addf %24, %29 : vector<64x16xf32>
    %31 = vector.extract_strided_slice %5 {offsets = [1, 1, 0], sizes = [8, 8, 32], strides = [1, 1, 1]} : vector<10x10x32xf32> to vector<8x8x32xf32>
    %32 = vector.shape_cast %31 : vector<8x8x32xf32> to vector<64x32xf32>
    %c128 = arith.constant 128 : index
    %c0_11 = arith.constant 0 : index
    %33 = vector.load %arg4[%c128, %c0_11] : memref<288x16xbf16, #tpu.memory_space<vmem>>, vector<32x16xbf16>
    %34 = arith.truncf %32 : vector<64x32xf32> to vector<64x32xbf16>
    %cst_12 = arith.constant dense<0.000000e+00> : vector<64x16xf32>
    %35 = tpu.matmul %34, %33, %cst_12 {dimension_numbers = #tpu.dot_dimension_numbers<[1], [0], [0], [1], [0, 0, 1, 1], [], []>} : vector<64x32xbf16>, vector<32x16xbf16>, vector<64x16xf32> -> vector<64x16xf32>
    %36 = arith.addf %30, %35 : vector<64x16xf32>
    %37 = vector.extract_strided_slice %5 {offsets = [1, 2, 0], sizes = [8, 8, 32], strides = [1, 1, 1]} : vector<10x10x32xf32> to vector<8x8x32xf32>
    %38 = vector.shape_cast %37 : vector<8x8x32xf32> to vector<64x32xf32>
    %c160 = arith.constant 160 : index
    %c0_13 = arith.constant 0 : index
    %39 = vector.load %arg4[%c160, %c0_13] : memref<288x16xbf16, #tpu.memory_space<vmem>>, vector<32x16xbf16>
    %40 = arith.truncf %38 : vector<64x32xf32> to vector<64x32xbf16>
    %cst_14 = arith.constant dense<0.000000e+00> : vector<64x16xf32>
    %41 = tpu.matmul %40, %39, %cst_14 {dimension_numbers = #tpu.dot_dimension_numbers<[1], [0], [0], [1], [0, 0, 1, 1], [], []>} : vector<64x32xbf16>, vector<32x16xbf16>, vector<64x16xf32> -> vector<64x16xf32>
    %42 = arith.addf %36, %41 : vector<64x16xf32>
    %43 = vector.extract_strided_slice %5 {offsets = [2, 0, 0], sizes = [8, 8, 32], strides = [1, 1, 1]} : vector<10x10x32xf32> to vector<8x8x32xf32>
    %44 = vector.shape_cast %43 : vector<8x8x32xf32> to vector<64x32xf32>
    %c192 = arith.constant 192 : index
    %c0_15 = arith.constant 0 : index
    %45 = vector.load %arg4[%c192, %c0_15] : memref<288x16xbf16, #tpu.memory_space<vmem>>, vector<32x16xbf16>
    %46 = arith.truncf %44 : vector<64x32xf32> to vector<64x32xbf16>
    %cst_16 = arith.constant dense<0.000000e+00> : vector<64x16xf32>
    %47 = tpu.matmul %46, %45, %cst_16 {dimension_numbers = #tpu.dot_dimension_numbers<[1], [0], [0], [1], [0, 0, 1, 1], [], []>} : vector<64x32xbf16>, vector<32x16xbf16>, vector<64x16xf32> -> vector<64x16xf32>
    %48 = arith.addf %42, %47 : vector<64x16xf32>
    %49 = vector.extract_strided_slice %5 {offsets = [2, 1, 0], sizes = [8, 8, 32], strides = [1, 1, 1]} : vector<10x10x32xf32> to vector<8x8x32xf32>
    %50 = vector.shape_cast %49 : vector<8x8x32xf32> to vector<64x32xf32>
    %c224 = arith.constant 224 : index
    %c0_17 = arith.constant 0 : index
    %51 = vector.load %arg4[%c224, %c0_17] : memref<288x16xbf16, #tpu.memory_space<vmem>>, vector<32x16xbf16>
    %52 = arith.truncf %50 : vector<64x32xf32> to vector<64x32xbf16>
    %cst_18 = arith.constant dense<0.000000e+00> : vector<64x16xf32>
    %53 = tpu.matmul %52, %51, %cst_18 {dimension_numbers = #tpu.dot_dimension_numbers<[1], [0], [0], [1], [0, 0, 1, 1], [], []>} : vector<64x32xbf16>, vector<32x16xbf16>, vector<64x16xf32> -> vector<64x16xf32>
    %54 = arith.addf %48, %53 : vector<64x16xf32>
    %55 = vector.extract_strided_slice %5 {offsets = [2, 2, 0], sizes = [8, 8, 32], strides = [1, 1, 1]} : vector<10x10x32xf32> to vector<8x8x32xf32>
    %56 = vector.shape_cast %55 : vector<8x8x32xf32> to vector<64x32xf32>
    %c256 = arith.constant 256 : index
    %c0_19 = arith.constant 0 : index
    %57 = vector.load %arg4[%c256, %c0_19] : memref<288x16xbf16, #tpu.memory_space<vmem>>, vector<32x16xbf16>
    %58 = arith.truncf %56 : vector<64x32xf32> to vector<64x32xbf16>
    %cst_20 = arith.constant dense<0.000000e+00> : vector<64x16xf32>
    %59 = tpu.matmul %58, %57, %cst_20 {dimension_numbers = #tpu.dot_dimension_numbers<[1], [0], [0], [1], [0, 0, 1, 1], [], []>} : vector<64x32xbf16>, vector<32x16xbf16>, vector<64x16xf32> -> vector<64x16xf32>
    %60 = arith.addf %54, %59 : vector<64x16xf32>
    %c0_21 = arith.constant 0 : index
    %c0_22 = arith.constant 0 : index
    %61 = vector.load %arg5[%c0_21, %c0_22] : memref<1x16xf32, #tpu.memory_space<vmem>>, vector<1x16xf32>
    %62 = vector.broadcast %61 : vector<1x16xf32> to vector<64x16xf32>
    %63 = arith.addf %60, %62 : vector<64x16xf32>
    %c0_23 = arith.constant 0 : index
    %c0_24 = arith.constant 0 : index
    %c0_25 = arith.constant 0 : index
    %64 = vector.load %arg6[%c0_23, %c0_24, %c0_25] : memref<1x64x16xf32, #tpu.memory_space<vmem>>, vector<1x64x16xf32>
    %65 = vector.shape_cast %64 : vector<1x64x16xf32> to vector<64x16xf32>
    %66 = vector.shape_cast %63 : vector<64x16xf32> to vector<1x64x16xf32>
    tpu.vector_store %arg6[%c0_23, %c0_24, %c0_25], %66 {strides = array<i32>} : memref<1x64x16xf32, #tpu.memory_space<vmem>>, vector<1x64x16xf32>,
    return
  }
  func.func @transform_0(%arg0: i32, %arg1: i32, %arg2: i32) -> (i32, i32, i32, i32) {
    %c0_i32 = arith.constant 0 : i32
    %c0_i32_0 = arith.constant 0 : i32
    %c0_i32_1 = arith.constant 0 : i32
    %c0_i32_2 = arith.constant 0 : i32
    return %arg0, %c0_i32, %c0_i32_0, %c0_i32_1 : i32, i32, i32, i32
  }
  func.func @transform_1(%arg0: i32, %arg1: i32, %arg2: i32) -> (i32, i32) {
    %c0_i32 = arith.constant 0 : i32
    %c0_i32_0 = arith.constant 0 : i32
    return %c0_i32, %arg2 : i32, i32
  }
  func.func @transform_2(%arg0: i32, %arg1: i32, %arg2: i32) -> (i32, i32) {
    %c0_i32 = arith.constant 0 : i32
    %c0_i32_0 = arith.constant 0 : i32
    return %c0_i32, %arg2 : i32, i32
  }
  func.func @transform_3(%arg0: i32, %arg1: i32, %arg2: i32) -> (i32, i32, i32) {
    %c0_i32 = arith.constant 0 : i32
    return %arg0, %arg1, %arg2 : i32, i32, i32
  }
}

</mosaic_0001>

<bundles_post_ra>
// kernel: space2depth_forward.3
= control target key start
LH: loop header
LB: loop body
LE: loop exit
PB: predicated region body
PF: predicated region fallthrough
CT: control target
= control target key end

     0   :  { %8 = vsyncpa [#allocation3], 0  ;;  %s2296_s0 = inlined_call_operand.vmem [shape: bf16[2,10,10,32], index: 0, kind: input, shape index: {}]   ;;  %s2297_s1 = inlined_call_operand.vmem [shape: bf16[288,16], index: 1, kind: input, shape index: {}]   ;;  %s2298_s2 = inlined_call_operand.vmem [shape: f32[1,16], index: 2, kind: input, shape index: {}]   ;;  %s2299_s3 = inlined_call_operand.hbm [shape: f32[2,64,16], index: 3, kind: output, shape index: {}]  }
   0x1   :  { %10 = vsyncpa [#allocation3 + $0x1], 0  ;;  %s1909_s12 = smov 0   ;;  %s1911_s13 = smov 0  }
   0x2   :  { %s1913_s14 = smov 0   ;;  %s1915_s15 = smov 0  }
   0x3   :  { %s1917_s16 = smov 0   ;;  %s1919_s17 = smov 0  }
   0x4 LB: > { %s1412_s18 = sadd.s32 4294967295, %s1884_s17   ;;  %s1413_s19 = sadd.s32 4294967294, %s1884_s17   ;;  %s1884_s17 = sphi %s1919_s17, %s16_s17   ;;  %s1880_s16 = sphi %s1917_s16, %s2306_s16   ;;  %s1876_s15 = sphi %s1915_s15, %s2305_s15   ;;  %s1872_s14 = sphi %s1913_s14, %s2304_s14   ;;  %s1868_s13 = sphi %s1911_s13, %s2303_s13   ;;  %s1864_s12 = sphi %s1909_s12, %s2302_s12  }
   0x5   : > { %s35_s20 = sadd.s32 1, %s1880_s16  ;;  %s124_s21 = sadd.s32 1, %s1872_s14 }
   0x6   : > { %p37_p0 = scmp.ge.s32.totalorder %s35_s20, 2  ;;  %p134_p1 = scmp.ne.s32.totalorder %s1872_s14, %s1868_s13 }
   0x7   : > { %p135_p2 = scmp.eq.s32.totalorder %s1412_s18, 1  ;;  %p140_p3 = scmp.ne.s32.totalorder %s1868_s13, %s1864_s12 }
   0x8   : > { %s2308_s20 = smov (%p37_p0, %s35_s20), 0  ;;  %p141_p5 = scmp.eq.s32.totalorder %s1413_s19, 1 }
   0x9   : > { %p1949_p4 = por %p135_p2, %p134_p1  ;;  %s117_s23 = ssub.s32 %s1880_s16, %s2308_s20 }
   0xa   : > { %p1418_p6 = scmp.ge.s32.totalorder %s1884_s17, 1  ;;  %p122_p7 = scmp.eq.s32.totalorder %s117_s23, 0 }
   0xb   : > { %p1956_p8 = por %p141_p5, %p140_p3  ;;  %p180_p9 = scmp.lt.s32.totalorder %s1884_s17, 3 }
   0xc   : > { %s1962_s25 = scalar_select %p122_p7, %s1872_s14, %s124_s21  }
   0xd   : > { %p181_p10 = pnand %p1418_p6, %p180_p9 }
   0xe   : > { %v1779_v0 = vld [vmem:[%s2297_s1 + $0x10] sm:$0xff] (!%p181_p10)   ;;  %p211_p11 = scmp.lt.s32.totalorder (!%p181_p10), %s1876_s15, 1  ;;  %v1971_v1 = vld [vmem:[%s2297_s1 + $0x40] sm:$0xff] (!%p181_p10)   ;;  %v1781_v2 = vld [vmem:[%s2297_s1 + $0x18] sm:$0xff] (!%p181_p10)   ;;  %vm293_vm0 = vcmask (!%p181_p10), 1046528   ;;  %vm346_vm1 = vcmask (!%p181_p10), 261120  }
   0xf   : > { %184 = sbr.rel (%p181_p10) target bundleno = 342 (0x156), region = 32  ;;  %1545 = vmatprep.subr.bf16.mxu1 (!%p181_p10), %v1779_v0  ;;  %1593 = vmatprep.subr.bf16.mxu0 (!%p181_p10), %v1971_v1  ;;  %v1981_v3 = vld [vmem:[%s2297_s1 + $0x48] sm:$0xff] (!%p181_p10)   ;;  %v1987_v4 = vld [vmem:[%s2297_s1] sm:$0xff] (!%p181_p10)   ;;  %v1993_v5 = vld [vmem:[%s2297_s1 + $0x50] sm:$0xff] (!%p181_p10)   ;;  %vm513_vm2 = vcmask (!%p181_p10), 1045504   ;;  %s208_s6 = sand.u32 (!%p181_p10), 1, %s1868_s13  }
  0x10   : > { %1546 = vmatpush3.bf16.msra.mxu1 (!%p181_p10), %v1779_v0  ;;  %1594 = vmatpush3.bf16.msra.mxu0 (!%p181_p10), %v1971_v1  ;;  %v1788_v47 = vld [vmem:[%s2297_s1 + $0x8] sm:$0xff] (!%p181_p10)   ;;  %v1787_v60 = vld [vmem:[%s2297_s1 + $0x58] sm:$0xff] (!%p181_p10)   ;;  %s1419_s7 = sshll.u32 (!%p181_p10), %s208_s6, 6  ;;  %vm1280_vm3 = vcmask (!%p181_p10), 130048   ;;  %s1490_s11 = sshll.u32 (!%p181_p10), %s1876_s15, 10 }
  0x11   : > { %1547 = vmatprep.subr.bf16.mxu1 (!%p181_p10), %v1781_v2  ;;  %1595 = vmatprep.subr.bf16.mxu0 (!%p181_p10), %v1981_v3  ;;  %s210_s10 = scalar_lea.vmem (!%p181_p10), [#allocation2], %s1419_s7  ;;  %s2241_s26 = scalar_lea.hbm (!%p181_p10), %s2299_s3, %s1490_s11 }
  0x12   : > { %s1306_s18 = sshll.u32 (!%p181_p10), %s210_s10, 4  ;;  %s1886_s28 = smov (!%p181_p10), [#allocation2]   ;;  %s2243_s18 = int_to_ptr.vmem [resolvable:$true] %s1306_s18 }
  0x13   : > { %s1806_s27 = scalar_lea.vmem (!%p181_p10), %s2243_s18, 1024  ;;  %s1810_s29 = sshll.u32 (!%p181_p10), %s1886_s28, 4  ;;  %s1811_s29 = int_to_ptr.vmem [resolvable:$false] %s1810_s29 }
  0x14   : > { %1548 = vmatpush3.bf16.msra.mxu1 (!%p181_p10), %v1781_v2  ;;  %1596 = vmatpush3.bf16.msra.mxu0 (!%p181_p10), %v1981_v3  ;;  %p1807_p12 = scmp.ne.s32.totalorder (!%p181_p10), %s2243_s18, %s1806_s27  ;;  %s1812_s30 = scalar_lea.vmem (!%p181_p10), %s1811_s29, 2048 }
  0x15   : > { %1557 = vmatprep.subr.bf16.mxu1 (!%p181_p10), %v1987_v4  ;;  %1605 = vmatprep.subr.bf16.mxu0 (!%p181_p10), %v1993_v5  ;;  %p1813_p1 = scmp.lt.s32.totalorder (!%p181_p10), %s2243_s18, %s1811_s29  ;;  %p1814_p2 = scmp.lt.s32.totalorder (!%p181_p10), %s1812_s30, %s1806_s27 }
  0x16   : > { %s212_s5 = scalar_select %p211_p11, %s1876_s15, 1 }
  0x17   : > { %s2250_s15 = scalar_lea.sflag [#allocation3], %s208_s6  ;;  %p1808_p13 = pnand %p1807_p12, %p1949_p4 }
  0x18   : > { %s1721_s8 = smul.u32 80, %s212_s5  ;;  %p1815_p3 = por %p1814_p2, %p1813_p1 }
  0x19   : > { %p1809_p0 = pneg %p1808_p13 }
  0x1a   : > { %s1998_s23 = scalar_lea.vmem %s2296_s0, %s1721_s8 }
  0x1b   : > { %v2001_v6 = vld [vmem:[%s1998_s23] sm:$0xf]  ;;  %v2004_v7 = vld [vmem:[%s1998_s23 + $0x4] sm:$0x1]  ;;  %v2007_v8 = vld [vmem:[%s1998_s23 + $0x8] sm:$0xf]  ;;  %p1816_p5 = pnand %p1815_p3, %p1809_p0 }
  0x1c   : > { %v232_v9 = vld [vmem:[%s1998_s23 + $0xc] sm:$0x1]  ;;  %v249_v10 = vunpack.c.l.bf16 %v2001_v6  ;;  %v250_v11 = vunpack.c.l.bf16 %v2004_v7  ;;  %v251_v12 = vunpack.c.l.bf16 %v2007_v8  ;;  %v2016_v13 = vld [vmem:[%s1998_s23 + $0x10] sm:$0xf]  ;;  %v234_v14 = vld [vmem:[%s1998_s23 + $0x14] sm:$0x1] }
  0x1d   : > { %v252_v15 = vunpack.c.l.bf16 %v232_v9  ;;  %v2020_v16 = vld [vmem:[%s1998_s23 + $0x18] sm:$0xf]  ;;  %v236_v17 = vld [vmem:[%s1998_s23 + $0x1c] sm:$0x1]  ;;  %v2024_v18 = vld [vmem:[%s1998_s23 + $0x20] sm:$0xf]  ;;  %v253_v19 = vunpack.c.l.bf16 %v2016_v13  ;;  %v254_v24 = vunpack.c.l.bf16 %v234_v14 }
  0x1e   : > { %v294_v20 = vrot.slane %v249_v10, 1  ;;  %v295_v21 = vrot.slane %v250_v11, 1  ;;  %v297_v22 = vrot.slane %v251_v12, 1  ;;  %v238_v23 = vld [vmem:[%s1998_s23 + $0x24] sm:$0x1]  ;;  %v517_v26 = vrot.slane %v251_v12, 2 }
  0x1f   : > { %v298_v25 = vrot.slane %v252_v15, 1  ;;  %v255_v28 = vunpack.c.l.bf16 %v2020_v16  ;;  %v256_v29 = vunpack.c.l.bf16 %v236_v17  ;;  %v257_v30 = vunpack.c.l.bf16 %v2024_v18  ;;  %v2038_v35 = vld [vmem:[%s1998_s23 + $0x28] sm:$0xf]  ;;  %v240_v40 = vld [vmem:[%s1998_s23 + $0x2c] sm:$0x1] }
  0x20   : > { %v296_v27 = vsel %vm293_vm0, %v294_v20, %v295_v21  ;;  %v518_v32 = vrot.slane %v252_v15, 2  ;;  %v258_v33 = vunpack.c.l.bf16 %v238_v23  ;;  %v300_v34 = vrot.slane %v253_v19, 1  ;;  %v2042_v41 = vld [vmem:[%s1998_s23 + $0x30] sm:$0xf]  ;;  %v242_v42 = vld [vmem:[%s1998_s23 + $0x34] sm:$0x1] }
  0x21   : > { %v299_v31 = vsel %vm293_vm0, %v297_v22, %v298_v25  ;;  %v301_v37 = vrot.slane %v254_v24, 1  ;;  %v303_v38 = vrot.slane %v255_v28, 1  ;;  %v304_v39 = vrot.slane %v256_v29, 1  ;;  %v2049_v48 = vld [vmem:[%s1998_s23 + $0x38] sm:$0xf]  ;;  %v1791_v15 = vld [vmem:[%s2297_s1 + $0x20] sm:$0xff]  }
  0x22   : > { %v330_v36 = vpack.c.bf16 %v299_v31, %v296_v27  ;;  %v306_v43 = vrot.slane %v257_v30, 1  ;;  %v307_v44 = vrot.slane %v258_v33, 1  ;;  %v520_v45 = vrot.slane %v253_v19, 2  ;;  %v2055_v51 = vld [vmem:[%s1998_s23 + $0x3c] sm:$0x1]  ;;  %v1789_v21 = vld [vmem:[%s2297_s1 + $0x60] sm:$0xff]  }
  0x23   : > { %v521_v46 = vrot.slane %v254_v24, 2  ;;  %v302_v49 = vsel %vm293_vm0, %v300_v34, %v301_v37  ;;  %v305_v50 = vsel %vm293_vm0, %v303_v38, %v304_v39  ;;  %v523_v54 = vrot.slane %v255_v28, 2  ;;  %v2085_v22 = vld [vmem:[%s1998_s23 + $0x40] sm:$0xf] }
  0x24   : > { %1549 = vmatprep.mubr.msk.bf16.mxu1 %vm346_vm1, %v330_v36  ;;  %v308_v52 = vsel %vm293_vm0, %v306_v43, %v307_v44  ;;  %v2058_v53 = vpack.c.bf16 %v305_v50, %v302_v49  ;;  %v524_v55 = vrot.slane %v256_v29, 2  ;;  %v526_v56 = vrot.slane %v257_v30, 2  ;;  %v2099_v29 = vld [vmem:[%s1998_s23 + $0x44] sm:$0x1] }
  0x25   : > { %v766_v57 = vpack.c.bf16 %v302_v49, %v299_v31  ;;  %v767_v58 = vpack.c.bf16 %v308_v52, %v305_v50  ;;  %v259_v59 = vunpack.c.l.bf16 %v2038_v35  ;;  %v260_v61 = vunpack.c.l.bf16 %v240_v40 }
  0x26   : > { %1550 = vmatmul.mubr.msk.bf16.vlgmr.msra.gmra.mrb[0].mxu1 %vm346_vm1, %v2058_v53  ;;  %v261_v62 = vunpack.c.l.bf16 %v2042_v41  ;;  %v262_v63 = vunpack.c.l.bf16 %v242_v42  ;;  %v263_v0 = vunpack.c.l.bf16 %v2049_v48  ;;  %v264_v9 = vunpack.c.l.bf16 %v2055_v51 }
  0x27   : > { %1597 = vmatprep.mubr.msk.bf16.mxu0 %vm346_vm1, %v766_v57  ;;  %1558 = vmatpush3.bf16.msra.mxu1 %v1987_v4  ;;  %v309_v2 = vrot.slane %v259_v59, 1  ;;  %v2072_v12 = vsel %vm513_vm2, %v517_v26, %v518_v32  ;;  %v2075_v14 = vsel %vm513_vm2, %v520_v45, %v521_v46  ;;  %v310_v17 = vrot.slane %v260_v61, 1  ;;  %v1794_v57 = vld [vmem:[%s2297_s1 + $0x28] sm:$0xff]  }
  0x28   : > { %1598 = vmatmul.mubr.msk.bf16.vlgmr.msra.gmra.mrb[0].mxu0 %vm346_vm1, %v767_v58  ;;  %1559 = vmatprep.subr.bf16.mxu1 %v1788_v47  ;;  %v312_v19 = vrot.slane %v261_v62, 1  ;;  %v313_v4 = vrot.slane %v262_v63, 1  ;;  %v315_v20 = vrot.slane %v263_v0, 1  ;;  %v527_v23 = vrot.slane %v258_v33, 2 }
  0x29   : > { %1606 = vmatpush3.bf16.msra.mxu0 %v1993_v5  ;;  %v316_v24 = vrot.slane %v264_v9, 1  ;;  %v875_v25 = vpack.c.bf16 %v2075_v14, %v2072_v12  ;;  %v2091_v26 = vsel %vm293_vm0, %v309_v2, %v310_v17  ;;  %v1421_v28 = vcombine.low %v2001_v6, %v2007_v8  ;;  %v1796_v6 = vld [vmem:[%s2297_s1 + $0x70] sm:$0xff]   ;;  %v1800_v2 = vld [vmem:[%s2297_s1 + $0x38] sm:$0xff]   ;;  %v248_v17 = vld [vmem:[%s1998_s23 + $0x4c] sm:$0x1] }
  0x2a   : > { %1607 = vmatprep.subr.bf16.mxu0 %v1787_v60  ;;  %v2094_v27 = vsel %vm293_vm0, %v312_v19, %v313_v4  ;;  %v2102_v30 = vpack.c.bf16 %v2091_v26, %v308_v52  ;;  %v529_v31 = vrot.slane %v259_v59, 2  ;;  %v530_v32 = vrot.slane %v260_v61, 2  ;;  %v1792_v52 = vld [vmem:[%s2297_s1 + $0x68] sm:$0xff]  }
  0x2b   : > { %v2105_v5 = vsel %vm293_vm0, %v315_v20, %v316_v24  ;;  %1560 = vmatpush3.bf16.msra.mxu1 %v1788_v47  ;;  %1609 = vmatprep.mubr.msk.bf16.mxu0 %vm346_vm1, %v875_v25  ;;  %v532_v34 = vrot.slane %v261_v62, 2  ;;  %v533_v36 = vrot.slane %v262_v63, 2  ;;  %v525_v37 = vsel %vm513_vm2, %v523_v54, %v524_v55  ;;  %v1798_v63 = vld [vmem:[%s2297_s1 + $0x78] sm:$0xff]  }
  0x2c   : > { %v2110_v33 = vpack.c.bf16 %v2105_v5, %v2094_v27  ;;  %1569 = vmatprep.subr.bf16.mxu1 %v1791_v15  ;;  %1553 = vmatprep.mubr.msk.bf16.mxu1 %vm346_vm1, %v2102_v30  ;;  %v528_v38 = vsel %vm513_vm2, %v526_v56, %v527_v23  ;;  %v265_v39 = vunpack.c.l.bf16 %v2085_v22  ;;  %v266_v40 = vunpack.c.l.bf16 %v2099_v29 }
  0x2d   : > { %1608 = vmatpush3.bf16.msra.mxu0 %v1787_v60  ;;  %v531_v42 = vsel %vm513_vm2, %v529_v31, %v530_v32  ;;  %v534_v43 = vsel %vm513_vm2, %v532_v34, %v533_v36  ;;  %v876_v44 = vpack.c.bf16 %v528_v38, %v525_v37  ;;  %v535_v45 = vrot.slane %v263_v0, 2 }
  0x2e   : > { %1554 = vmatmul.mubr.msk.bf16.gmra.mrb[4].mxu1 %vm346_vm1, %v2110_v33  ;;  %1617 = vmatprep.subr.bf16.mxu0 %v1789_v21  ;;  %v877_v46 = vpack.c.bf16 %v534_v43, %v531_v42  ;;  %v536_v47 = vrot.slane %v264_v9, 2  ;;  %v867_v49 = vrot.slane %v265_v39, 2  ;;  %v868_v50 = vrot.slane %v266_v40, 2  ;;  %v247_v9 = vld [vmem:[%s1998_s23 + $0x48] sm:$0xf] }
  0x2f   : > { %1561 = vmatprep.mubr.msk.bf16.mxu1 %vm346_vm1, %v1421_v28  ;;  %v1422_v51 = vcombine.low %v2016_v13, %v2020_v16  ;;  %v1423_v54 = vcombine.low %v2024_v18, %v2038_v35  ;;  %v514_v55 = vrot.slane %v249_v10, 2  ;;  %v515_v56 = vrot.slane %v250_v11, 2  ;;  %v1797_v11 = vld [vmem:[%s2297_s1 + $0x30] sm:$0xff]  }
  0x30   : > { %v537_v58 = vsel %vm513_vm2, %v535_v45, %v536_v47  ;;  %v2145_v59 = vsel %vm513_vm2, %v867_v49, %v868_v50  ;;  %v1424_v60 = vcombine.low %v2042_v41, %v2049_v48  ;;  %v551_v62 = vpack.c.bf16 %v525_v37, %v2075_v14 }
  0x31   : > { %v878_v7 = vpack.c.bf16 %v2145_v59, %v537_v58  ;;  %v516_v10 = vsel %vm513_vm2, %v514_v55, %v515_v56  ;;  %v552_v0 = vpack.c.bf16 %v531_v42, %v528_v38  ;;  %v1465_v14 = vcombine.low %v2085_v22, %v247_v9 }
  0x32   : > { %v550_v61 = vpack.c.bf16 %v2072_v12, %v516_v10  ;;  %v1801_v12 = vld [vmem:[%s2297_s1 + $0x80] sm:$0xff]   ;;  %v1443_v19 = vcombine.low %v2007_v8, %v2016_v13  ;;  %v267_v4 = vunpack.c.l.bf16 %v247_v9  ;;  %v268_v20 = vunpack.c.l.bf16 %v248_v17 }
  0x33   : > { %v758_v23 = vrot.slane %v265_v39, 1  ;;  %v759_v8 = vrot.slane %v266_v40, 1  ;;  %v1444_v24 = vcombine.low %v2020_v16, %v2024_v18  ;;  %v1445_v25 = vcombine.low %v2038_v35, %v2042_v41 }
  0x34   : > { %1610 = vmatmul.mubr.msk.bf16.vlgmr.msra.gmra.mrb[0].mxu0 %vm346_vm1, %v876_v44  ;;  %v1072_v13 = vrot.slane %v268_v20, 1  ;;  %v1446_v18 = vcombine.low %v2049_v48, %v2085_v22  ;;  %v768_v35 = vpack.c.bf16 %v2094_v27, %v2091_v26  ;;  %v1169_v41 = vrot.slane %v268_v20, 2 }
  0x35   : > { %1618 = vmatpush3.bf16.msra.mxu0 %v1789_v21  ;;  %1613 = vmatprep.mubr.msk.bf16.mxu0 %vm346_vm1, %v877_v46  ;;  %v1071_v21 = vrot.slane %v267_v4, 1  ;;  %v760_v28 = vsel %vm293_vm0, %v758_v23, %v759_v8 }
  0x36   : > { %1562 = vmatmul.mubr.msk.bf16.vlgmr.msra.gmra.mrb[0].mxu1 %vm346_vm1, %v1422_v51  ;;  %1619 = vmatprep.subr.bf16.mxu0 %v1792_v52  ;;  %v769_v48 = vpack.c.bf16 %v760_v28, %v2105_v5 }
  0x37   : > { %1570 = vmatpush3.bf16.msra.mxu1 %v1791_v15  ;;  %1565 = vmatprep.mubr.msk.bf16.mxu1 %vm346_vm1, %v1423_v54  ;;  %v553_v15 = vpack.c.bf16 %v537_v58, %v534_v43  ;;  %v1073_v29 = vsel %vm293_vm0, %v1071_v21, %v1072_v13 }
  0x38   : > { %1571 = vmatprep.subr.bf16.mxu1 %v1794_v57  ;;  %v1079_v16 = vpack.c.bf16 %v1073_v29, %v760_v28 }
  0x39   : > { %1620 = vmatpush3.bf16.msra.mxu0 %v1792_v52 }
  0x3a   : > { %1629 = vmatprep.subr.bf16.mxu0 %v1796_v6 }
  0x3b   : > { %1572 = vmatpush3.bf16.msra.mxu1 %v1794_v57 }
  0x3c   : > { %1614 = vmatmul.mubr.msk.bf16.gmra.mrb[4].mxu0 %vm346_vm1, %v878_v7  ;;  %1581 = vmatprep.subr.bf16.mxu1 %v1797_v11 }
  0x3d   : > { %1621 = vmatprep.mubr.msk.bf16.mxu0 %vm346_vm1, %v1422_v51 }
  0x3e   : > { %1566 = vmatmul.mubr.msk.bf16.gmra.mrb[4].mxu1 %vm346_vm1, %v1424_v60 }
  0x3f   : > { %1573 = vmatprep.mubr.msk.bf16.mxu1 %vm346_vm1, %v550_v61 }
  0x44   : > { %1622 = vmatmul.mubr.msk.bf16.vlgmr.msra.gmra.mrb[0].mxu0 %vm346_vm1, %v1423_v54 }
  0x45   : > { %1630 = vmatpush3.bf16.msra.mxu0 %v1796_v6  ;;  %1625 = vmatprep.mubr.msk.bf16.mxu0 %vm346_vm1, %v1424_v60 }
  0x46   : > { %1574 = vmatmul.mubr.msk.bf16.vlgmr.msra.gmra.mrb[0].mxu1 %vm346_vm1, %v551_v62  ;;  %1631 = vmatprep.subr.bf16.mxu0 %v1798_v63 }
  0x47   : > { %1582 = vmatpush3.bf16.msra.mxu1 %v1797_v11  ;;  %1577 = vmatprep.mubr.msk.bf16.mxu1 %vm346_vm1, %v552_v0 }
  0x48   : > { %1583 = vmatprep.subr.bf16.mxu1 %v1800_v2 }
  0x49   : > { %1632 = vmatpush3.bf16.msra.mxu0 %v1798_v63 }
  0x4a   : > { %1641 = vmatprep.subr.bf16.mxu0 %v1801_v12 }
  0x4b   : > { %1584 = vmatpush3.bf16.msra.mxu1 %v1800_v2 }
  0x4c   : > { %1626 = vmatmul.mubr.msk.bf16.gmra.mrb[4].mxu0 %vm346_vm1, %v1465_v14  ;;  %1653 = vmatprep.subr.bf16.mxu1 %v1971_v1 }
  0x4d   : > { %1633 = vmatprep.mubr.msk.bf16.mxu0 %vm346_vm1, %v2058_v53  ;;  %v1803_v53 = vld [vmem:[%s2297_s1 + $0x88] sm:$0xff]  }
  0x4e   : > { %1578 = vmatmul.mubr.msk.bf16.gmra.mrb[4].mxu1 %vm346_vm1, %v553_v15 }
  0x4f   : > { %1585 = vmatprep.mubr.msk.bf16.mxu1 %vm346_vm1, %v1443_v19 }
  0x54   : > { %1634 = vmatmul.mubr.msk.bf16.vlgmr.msra.gmra.mrb[0].mxu0 %vm346_vm1, %v2102_v30 }
  0x55   : > { %1642 = vmatpush3.bf16.msra.mxu0 %v1801_v12  ;;  %1637 = vmatprep.mubr.msk.bf16.mxu0 %vm346_vm1, %v2110_v33  ;;  %v1484_v33 = vld [vmem:[%s2298_s2] ss:$0 sm:$0xff] }
  0x56   : > { %1586 = vmatmul.mubr.msk.bf16.vlgmr.msra.gmra.mrb[0].mxu1 %vm346_vm1, %v1444_v24  ;;  %1643 = vmatprep.subr.bf16.mxu0 %v1803_v53 }
  0x57   : > { %1655 = vmatpush3.bf16.msra.mxu1 %v1971_v1  ;;  %1589 = vmatprep.mubr.msk.bf16.mxu1 %vm346_vm1, %v1445_v25  ;;  %v1168_v1 = vrot.slane %v267_v4, 2 }
  0x58   : > { %1654 = vmatprep.subr.bf16.mxu1 %v1981_v3 }
  0x59   : > { %1644 = vmatpush3.bf16.msra.mxu0 %v1803_v53 }
  0x5b   : > { %1656 = vmatpush3.bf16.msra.mxu1 %v1981_v3  ;;  %v1170_v3 = vsel %vm513_vm2, %v1168_v1, %v1169_v41 }
  0x5c   : > { %1638 = vmatmul.mubr.msk.bf16.gmra.mrb[4].mxu0 %vm346_vm1, %v1079_v16  ;;  %v1176_v22 = vpack.c.bf16 %v1170_v3, %v2145_v59 }
  0x5d   : > { %1645 = vmatprep.mubr.msk.bf16.mxu0 %vm346_vm1, %v551_v62 }
  0x5e   : > { %1590 = vmatmul.mubr.msk.bf16.gmra.mrb[4].mxu1 %vm346_vm1, %v1446_v18 }
  0x5f   : > { %1601 = vmatprep.mubr.msk.bf16.mxu1 %vm346_vm1, %v768_v35 }
  0x64   : > { %1646 = vmatmul.mubr.msk.bf16.vlgmr.msra.gmra.mrb[0].mxu0 %vm346_vm1, %v552_v0 }
  0x65   : > { %1649 = vmatprep.mubr.msk.bf16.mxu0 %vm346_vm1, %v553_v15 }
  0x6a   : > { %1602 = vmatmul.mubr.msk.bf16.vlgmr.msra.gmra.mrb[4].mxu1 %vm346_vm1, %v769_v48 }
  0x6c   : > { %1650 = vmatmul.mubr.msk.bf16.gmra.mrb[4].mxu0 %vm346_vm1, %v1176_v22 }
 0x129   : > { %v1587_v26 = vpop.f32.mrb[0].mxu1 }
 0x12a   : > { %v717_v27 = vpop.f32.mrb[1].mxu1 }
 0x12b   : > { %v1588_v30 = vpop.f32.mrb[2].mxu1 }
 0x12c   : > { %v720_v31 = vpop.f32.mrb[3].mxu1 }
 0x137   : > { %v1647_v32 = vpop.f32.mrb[0].mxu0 }
 0x138   : > { %v1657_v34 = vadd.f32 %v1647_v32, %v1587_v26  ;;  %v1226_v5 = vpop.f32.mrb[1].mxu0 }
 0x139   : > { %v1658_v36 = vadd.f32 %v1226_v5, %v717_v27  ;;  %v1648_v37 = vpop.f32.mrb[2].mxu0 }
 0x13a   : > { %v1274_v38 = vadd.f32 %v1657_v34, %v1484_v33  ;;  %v1659_v39 = vadd.f32 %v1648_v37, %v1588_v30  ;;  %v1229_v40 = vpop.f32.mrb[3].mxu0 }
 0x13b   : > { %v1272_v42 = vadd.f32 %v1658_v36, %v1484_v33  ;;  %v1660_v43 = vadd.f32 %v1229_v40, %v720_v31 }
 0x13c   : > { %1283 = vst.msk [vmem:[%s210_s10 + $0x10] sm:$0xff] %vm1280_vm3, %v1274_v38  ;;  %v1275_v44 = vadd.f32 %v1659_v39, %v1484_v33 }
 0x13d   : > { %1281 = vst.msk [vmem:[%s210_s10] sm:$0xff] %vm1280_vm3, %v1272_v42  ;;  %v1273_v45 = vadd.f32 %v1660_v43, %v1484_v33  ;;  %v1603_v46 = vpop.f32.mrb[4].mxu1 }
 0x13e   : > { %1284 = vst.msk [vmem:[%s210_s10 + $0x18] sm:$0xff] %vm1280_vm3, %v1275_v44  ;;  %v844_v47 = vpop.f32.mrb[5].mxu1 }
 0x13f   : > { %1282 = vst.msk [vmem:[%s210_s10 + $0x8] sm:$0xff] %vm1280_vm3, %v1273_v45  ;;  %v1651_v49 = vpop.f32.mrb[4].mxu0  ;;  %v1604_v50 = vpop.f32.mrb[6].mxu1 }
 0x140   : > { %v1661_v51 = vadd.f32 %v1651_v49, %v1603_v46  ;;  %v1242_v52 = vpop.f32.mrb[5].mxu0  ;;  %v847_v54 = vpop.f32.mrb[7].mxu1 }
 0x141   : > { %v1662_v55 = vadd.f32 %v1242_v52, %v844_v47  ;;  %v1652_v56 = vpop.f32.mrb[6].mxu0 }
 0x142   : > { %v1278_v57 = vadd.f32 %v1661_v51, %v1484_v33  ;;  %v1663_v58 = vadd.f32 %v1652_v56, %v1604_v50  ;;  %v1245_v59 = vpop.f32.mrb[7].mxu0 }
 0x143   : > { %v1276_v6 = vadd.f32 %v1662_v55, %v1484_v33  ;;  %v1664_v7 = vadd.f32 %v1245_v59, %v847_v54 }
 0x144   : > { %1287 = vst.msk [vmem:[%s210_s10 + $0x30] sm:$0xff] %vm1280_vm3, %v1278_v57  ;;  %v1279_v10 = vadd.f32 %v1663_v58, %v1484_v33 }
 0x145   : > { %1285 = vst.msk [vmem:[%s210_s10 + $0x20] sm:$0xff] %vm1280_vm3, %v1276_v6  ;;  %v1277_v11 = vadd.f32 %v1664_v7, %v1484_v33 }
 0x146   : > { %1288 = vst.msk [vmem:[%s210_s10 + $0x38] sm:$0xff] %vm1280_vm3, %v1279_v10 }
 0x147   : > { %1286 = vst.msk [vmem:[%s210_s10 + $0x28] sm:$0xff] %vm1280_vm3, %v1277_v11 }
 0x148   : > { %1819 = shalt.err (!%p1816_p5)
}
 0x149   : > { %s1820_s4 = scalar_lea.hbm %s2241_s26, 1024  ;;  %s1824_s6 = scalar_lea.hbm %s2299_s3, 2048 }
 0x14a   : > { %p1821_p6 = scmp.ne.s32.totalorder %s2241_s26, %s1820_s4  ;;  %p1825_p10 = scmp.lt.u32.totalorder %s2241_s26, %s2299_s3 }
 0x14b   : > { %p1826_p11 = scmp.lt.u32.totalorder %s1824_s6, %s1820_s4  ;;  %p1828_p13 = scmp.lt.u32.totalorder %s1820_s4, %s2241_s26 }
 0x14c   : > { %p1822_p7 = pnand %p1821_p6, %p1949_p4 }
 0x14d   : > { %p1827_p12 = por %p1826_p11, %p1825_p10 }
 0x14e   : > { %p1823_p9 = pneg %p1822_p7 }
 0x14f   : > { %p1829_p0 = por %p1828_p13, %p1827_p12 }
 0x151   : > { %p1830_p1 = pnand %p1829_p0, %p1823_p9 }
 0x153   : > { %1833 = shalt.err (!%p1830_p1)
}
 0x154   : > { %s1887_s9 = smov 128   ;;  %s1888_s10 = smov 8  }
 0x155   : > { %1722 = dma.vmem_to_hbm [thread:$0]  (%p1949_p4), %s2243_s18, 1024, %s2241_s26, %s2250_s15, %s1887_s9, %s1887_s9, %s1888_s10  }
 0x156 PF: > { %p1728_p2 = scmp.ge.s32.totalorder %s1884_s17, 2  ;;  %s1321_s11 = sand.u32 1, %s1864_s12  }
 0x157   : > { %s1322_s19 = scalar_lea.sflag [#allocation3], %s1321_s11 }
 0x158   : > { %p1725_p3 = pnand %p1728_p2, %p1956_p8 }
 0x15a   : > { %1859 = dma.done.wait (!%p1725_p3), %s1322_s19, 1024  }
 0x15b   : > { %1861 = vsyncadd (!%p1725_p3), %s1322_s19, 4294966272  ;;  %s16_s17 = sadd.s32 1, %s1884_s17   ;;  %s2302_s12 = smov %s1868_s13 }
 0x15c   : > { %p13_p5 = scmp.ge.s32.totalorder %s16_s17, 4   ;;  %s2303_s13 = smov %s1872_s14 }
 0x15d   : > { %s2304_s14 = smov %s1962_s25  ;;  %s2305_s15 = smov %s1880_s16 }
 0x15e   : > { %s2306_s16 = smov %s2308_s20  ;;  %15 = sbr.rel (!%p13_p5) target bundleno = 4 (0x4), region = 74 }
 0x165   :  { %1327 = vsyncpa [#allocation3], 1 }
 0x166   :  { %1329 = vsyncpa [#allocation3 + $0x1], 1 }

// kernel: space2depth_forward.2
= control target key start
LH: loop header
LB: loop body
LE: loop exit
PB: predicated region body
PF: predicated region fallthrough
CT: control target
= control target key end

     0   :  { %s1760_s12 = smov 0   ;;  %s1762_s13 = smov 0   ;;  %s2035_s0 = inlined_call_operand.vmem [shape: bf16[2,10,10,16], index: 0, kind: input, shape index: {}]   ;;  %s2036_s1 = inlined_call_operand.vmem [shape: bf16[144,32], index: 1, kind: input, shape index: {}]   ;;  %s2037_s2 = inlined_call_operand.vmem [shape: f32[1,32], index: 2, kind: input, shape index: {}]   ;;  %s2038_s3 = inlined_call_operand.vmem [shape: bf16[2,64,32], index: 3, kind: output, shape index: {}]  }
   0x1   :  { %s1764_s14 = smov 0  }
   0x2 LB: > { %s32_s15 = sadd.s32 1, %s1734_s13  ;;  %p1394_p0 = scmp.ge.s32.totalorder %s1738_s14, 1  ;;  %s1738_s14 = sphi %s1764_s14, %s13_s14   ;;  %s1734_s13 = sphi %s1762_s13, %s2040_s13   ;;  %s1730_s12 = sphi %s1760_s12, %s2039_s12  }
   0x3   : > { %p34_p1 = scmp.ge.s32.totalorder %s32_s15, 2  ;;  %p177_p2 = scmp.lt.s32.totalorder %s1738_s14, 3 }
   0x5   : > { %s2042_s15 = smov (%p34_p1, %s32_s15), 0  ;;  %p178_p3 = pnand %p1394_p0, %p177_p2 }
   0x6   : > { %v1698_v0 = vld [vmem:[%s2036_s1 + $0x8] sm:$0xff] (!%p178_p3)   ;;  %p215_p4 = scmp.lt.s32.totalorder (!%p178_p3), %s1730_s12, 1  ;;  %v1784_v1 = vld [vmem:[%s2036_s1 + $0x20] sm:$0xff] (!%p178_p3)   ;;  %vm307_vm0 = vcmask (!%p178_p3), 1046528   ;;  %vm352_vm1 = vcmask (!%p178_p3), 130048   ;;  %vm513_vm2 = vcmask (!%p178_p3), 1045504  }
   0x7   : > { %181 = sbr.rel (%p178_p3) target bundleno = 320 (0x140), region = 32  ;;  %1517 = vmatprep.subr.bf16.mxu1 (!%p178_p3), %v1698_v0  ;;  %1557 = vmatprep.subr.bf16.mxu0 (!%p178_p3), %v1784_v1  ;;  %v1792_v2 = vld [vmem:[%s2036_s1] sm:$0xff] (!%p178_p3)   ;;  %v1799_v3 = vld [vmem:[%s2036_s1 + $0x28] sm:$0xff] (!%p178_p3)   ;;  %v1863_v52 = vld [vmem:[%s2036_s1 + $0x10] sm:$0xff] (!%p178_p3)   ;;  %vm1256_vm3 = vcmask (!%p178_p3), 257024  }
   0x8   : > { %1518 = vmatpush3.bf16.msra.mxu1 (!%p178_p3), %v1698_v0  ;;  %1558 = vmatpush3.bf16.msra.mxu0 (!%p178_p3), %v1784_v1  ;;  %v1704_v61 = vld [vmem:[%s2036_s1 + $0x30] sm:$0xff] (!%p178_p3)  }
   0x9   : > { %1527 = vmatprep.subr.bf16.mxu1 (!%p178_p3), %v1792_v2  ;;  %1567 = vmatprep.subr.bf16.mxu0 (!%p178_p3), %v1799_v3 }
   0xe   : > { %s2044_s12 = smov (!%p215_p4, %s1730_s12), 1 }
   0xf   : > { %s1673_s22 = smul.u32 80, %s2044_s12  ;;  %s1463_s17 = sshll.u32 %s2044_s12, 5 }
  0x10   : > { %s2008_s20 = scalar_lea.vmem %s2038_s3, %s1463_s17 }
  0x11   : > { %s1805_s27 = scalar_lea.vmem %s2035_s0, %s1673_s22 }
  0x12   : > { %v1809_v4 = vld [vmem:[%s1805_s27] sm:$0xf]  ;;  %v1812_v5 = vld [vmem:[%s1805_s27 + $0x4] sm:$0x1]  ;;  %v1815_v6 = vld [vmem:[%s1805_s27 + $0x8] sm:$0xf] }
  0x13   : > { %v248_v7 = vld [vmem:[%s1805_s27 + $0xc] sm:$0x1]  ;;  %v265_v8 = vunpack.c.l.bf16 %v1809_v4  ;;  %v266_v9 = vunpack.c.l.bf16 %v1812_v5  ;;  %v267_v10 = vunpack.c.l.bf16 %v1815_v6  ;;  %v1822_v11 = vld [vmem:[%s1805_s27 + $0x10] sm:$0xf]  ;;  %v250_v12 = vld [vmem:[%s1805_s27 + $0x14] sm:$0x1] }
  0x14   : > { %v268_v13 = vunpack.c.l.bf16 %v248_v7  ;;  %v1826_v14 = vld [vmem:[%s1805_s27 + $0x18] sm:$0xf]  ;;  %v252_v15 = vld [vmem:[%s1805_s27 + $0x1c] sm:$0x1]  ;;  %v1830_v16 = vld [vmem:[%s1805_s27 + $0x20] sm:$0xf]  ;;  %v269_v17 = vunpack.c.l.bf16 %v1822_v11  ;;  %v270_v22 = vunpack.c.l.bf16 %v250_v12 }
  0x15   : > { %v308_v18 = vrot.slane %v265_v8, 1  ;;  %v309_v19 = vrot.slane %v266_v9, 1  ;;  %v311_v20 = vrot.slane %v267_v10, 1  ;;  %v254_v21 = vld [vmem:[%s1805_s27 + $0x24] sm:$0x1]  ;;  %v517_v24 = vrot.slane %v267_v10, 2 }
  0x16   : > { %v312_v23 = vrot.slane %v268_v13, 1  ;;  %v271_v26 = vunpack.c.l.bf16 %v1826_v14  ;;  %v272_v27 = vunpack.c.l.bf16 %v252_v15  ;;  %v273_v28 = vunpack.c.l.bf16 %v1830_v16  ;;  %v1843_v33 = vld [vmem:[%s1805_s27 + $0x28] sm:$0xf]  ;;  %v256_v38 = vld [vmem:[%s1805_s27 + $0x2c] sm:$0x1] }
  0x17   : > { %v310_v25 = vsel %vm307_vm0, %v308_v18, %v309_v19  ;;  %v518_v30 = vrot.slane %v268_v13, 2  ;;  %v274_v31 = vunpack.c.l.bf16 %v254_v21  ;;  %v314_v32 = vrot.slane %v269_v17, 1  ;;  %v1847_v39 = vld [vmem:[%s1805_s27 + $0x30] sm:$0xf]  ;;  %v258_v42 = vld [vmem:[%s1805_s27 + $0x34] sm:$0x1] }
  0x18   : > { %v313_v29 = vsel %vm307_vm0, %v311_v20, %v312_v23  ;;  %v315_v35 = vrot.slane %v270_v22, 1  ;;  %v317_v36 = vrot.slane %v271_v26, 1  ;;  %v318_v37 = vrot.slane %v272_v27, 1  ;;  %v1851_v43 = vld [vmem:[%s1805_s27 + $0x38] sm:$0xf] }
  0x19   : > { %v342_v34 = vpack.c.bf16 %v313_v29, %v310_v25  ;;  %v320_v40 = vrot.slane %v273_v28, 1  ;;  %v321_v41 = vrot.slane %v274_v31, 1  ;;  %v520_v46 = vrot.slane %v269_v17, 2  ;;  %v260_v51 = vld [vmem:[%s1805_s27 + $0x3c] sm:$0x1] }
  0x1a   : > { %v316_v44 = vsel %vm307_vm0, %v314_v32, %v315_v35  ;;  %v319_v45 = vsel %vm307_vm0, %v317_v36, %v318_v37  ;;  %v521_v47 = vrot.slane %v270_v22, 2  ;;  %v523_v50 = vrot.slane %v271_v26, 2  ;;  %v1895_v23 = vld [vmem:[%s1805_s27 + $0x40] sm:$0xf] }
  0x1b   : > { %1519 = vmatprep.mubr.msk.bf16.mxu1 %vm352_vm1, %v342_v34  ;;  %v322_v48 = vsel %vm307_vm0, %v320_v40, %v321_v41  ;;  %v1857_v49 = vpack.c.bf16 %v319_v45, %v316_v44  ;;  %v524_v53 = vrot.slane %v272_v27, 2  ;;  %v748_v54 = vpack.c.bf16 %v316_v44, %v313_v29 }
  0x1c   : > { %v749_v55 = vpack.c.bf16 %v322_v48, %v319_v45  ;;  %v275_v56 = vunpack.c.l.bf16 %v1843_v33  ;;  %v276_v57 = vunpack.c.l.bf16 %v256_v38  ;;  %v277_v58 = vunpack.c.l.bf16 %v1847_v39 }
  0x1d   : > { %1520 = vmatmul.mubr.msk.bf16.vlgmr.msra.gmra.mrb[0].mxu1 %vm352_vm1, %v1857_v49  ;;  %v278_v59 = vunpack.c.l.bf16 %v258_v42  ;;  %v279_v60 = vunpack.c.l.bf16 %v1851_v43  ;;  %1559 = vmatprep.mubr.msk.bf16.mxu0 %vm352_vm1, %v748_v54  ;;  %v280_v63 = vunpack.c.l.bf16 %v260_v51  ;;  %v1876_v0 = vsel %vm513_vm2, %v517_v24, %v518_v30  ;;  %v1898_v24 = vld [vmem:[%s1805_s27 + $0x44] sm:$0x1] }
  0x1e   : > { %1528 = vmatpush3.bf16.msra.mxu1 %v1792_v2  ;;  %v323_v62 = vrot.slane %v275_v56, 1  ;;  %v1879_v7 = vsel %vm513_vm2, %v520_v46, %v521_v47  ;;  %1560 = vmatmul.mubr.msk.bf16.vlgmr.msra.gmra.mrb[0].mxu0 %vm352_vm1, %v749_v55  ;;  %v324_v10 = vrot.slane %v276_v57, 1  ;;  %v326_v12 = vrot.slane %v277_v58, 1  ;;  %v1709_v47 = vld [vmem:[%s2036_s1 + $0x38] sm:$0xff]  }
  0x1f   : > { %v327_v13 = vrot.slane %v278_v59, 1  ;;  %v329_v15 = vrot.slane %v279_v60, 1  ;;  %1537 = vmatprep.subr.bf16.mxu1 %v1863_v52  ;;  %v526_v17 = vrot.slane %v273_v28, 2  ;;  %v527_v2 = vrot.slane %v274_v31, 2  ;;  %1568 = vmatpush3.bf16.msra.mxu0 %v1799_v3 }
  0x20   : > { %v330_v18 = vrot.slane %v280_v63, 1  ;;  %v849_v19 = vpack.c.bf16 %v1879_v7, %v1876_v0  ;;  %v1887_v20 = vsel %vm307_vm0, %v323_v62, %v324_v10  ;;  %1577 = vmatprep.subr.bf16.mxu0 %v1704_v61  ;;  %v1398_v22 = vcombine.low %v1809_v4, %v1815_v6 }
  0x21   : > { %v1890_v21 = vsel %vm307_vm0, %v326_v12, %v327_v13  ;;  %v1901_v3 = vpack.c.bf16 %v1887_v20, %v322_v48  ;;  %v529_v26 = vrot.slane %v275_v56, 2  ;;  %v530_v27 = vrot.slane %v276_v57, 2  ;;  %v1712_v56 = vld [vmem:[%s2036_s1 + $0x40] sm:$0xff]  }
  0x22   : > { %v1904_v25 = vsel %vm307_vm0, %v329_v15, %v330_v18  ;;  %1569 = vmatprep.mubr.msk.bf16.mxu0 %vm352_vm1, %v849_v19  ;;  %v532_v29 = vrot.slane %v277_v58, 2  ;;  %v533_v30 = vrot.slane %v278_v59, 2  ;;  %v525_v31 = vsel %vm513_vm2, %v523_v50, %v524_v53  ;;  %v1710_v53 = vld [vmem:[%s2036_s1 + $0x18] sm:$0xff]   ;;  %v263_v58 = vld [vmem:[%s1805_s27 + $0x48] sm:$0xf] }
  0x23   : > { %v1909_v28 = vpack.c.bf16 %v1904_v25, %v1890_v21  ;;  %1523 = vmatprep.mubr.msk.bf16.mxu1 %vm352_vm1, %v1901_v3  ;;  %v528_v32 = vsel %vm513_vm2, %v526_v17, %v527_v2  ;;  %v281_v34 = vunpack.c.l.bf16 %v1895_v23  ;;  %v282_v35 = vunpack.c.l.bf16 %v1898_v24 }
  0x24   : > { %v531_v36 = vsel %vm513_vm2, %v529_v26, %v530_v27  ;;  %v534_v37 = vsel %vm513_vm2, %v532_v29, %v533_v30  ;;  %v850_v38 = vpack.c.bf16 %v528_v32, %v525_v31  ;;  %v535_v40 = vrot.slane %v279_v60, 2 }
  0x25   : > { %1524 = vmatmul.mubr.msk.bf16.gmra.mrb[4].mxu1 %vm352_vm1, %v1909_v28  ;;  %v851_v41 = vpack.c.bf16 %v534_v37, %v531_v36  ;;  %v536_v42 = vrot.slane %v280_v63, 2  ;;  %v843_v44 = vrot.slane %v281_v34, 2  ;;  %v844_v45 = vrot.slane %v282_v35, 2 }
  0x26   : > { %1529 = vmatprep.mubr.msk.bf16.mxu1 %vm352_vm1, %v1398_v22  ;;  %v1399_v46 = vcombine.low %v1822_v11, %v1826_v14  ;;  %v1400_v48 = vcombine.low %v1830_v16, %v1843_v33  ;;  %v514_v50 = vrot.slane %v265_v8, 2  ;;  %v515_v51 = vrot.slane %v266_v9, 2 }
  0x27   : > { %v537_v54 = vsel %vm513_vm2, %v535_v40, %v536_v42  ;;  %v1940_v55 = vsel %vm513_vm2, %v843_v44, %v844_v45  ;;  %v1401_v8 = vcombine.low %v1847_v39, %v1851_v43  ;;  %v550_v57 = vpack.c.bf16 %v531_v36, %v528_v32 }
  0x28   : > { %v852_v4 = vpack.c.bf16 %v1940_v55, %v537_v54  ;;  %v516_v5 = vsel %vm513_vm2, %v514_v50, %v515_v51  ;;  %v1436_v59 = vcombine.low %v1895_v23, %v263_v58  ;;  %v551_v60 = vpack.c.bf16 %v537_v54, %v534_v37 }
  0x29   : > { %v548_v9 = vpack.c.bf16 %v1876_v0, %v516_v5  ;;  %v1417_v62 = vcombine.low %v1815_v6, %v1822_v11  ;;  %v283_v63 = vunpack.c.l.bf16 %v263_v58  ;;  %v742_v10 = vrot.slane %v281_v34, 1 }
  0x2a   : > { %1570 = vmatmul.mubr.msk.bf16.vlgmr.msra.gmra.mrb[0].mxu0 %vm352_vm1, %v850_v38  ;;  %v743_v12 = vrot.slane %v282_v35, 1  ;;  %v1418_v15 = vcombine.low %v1826_v14, %v1830_v16  ;;  %v1419_v6 = vcombine.low %v1843_v33, %v1847_v39  ;;  %v1420_v16 = vcombine.low %v1851_v43, %v1895_v23  ;;  %v1452_v23 = vld [vmem:[%s2037_s2] ss:$0 sm:$0xff] }
  0x2b   : > { %1578 = vmatpush3.bf16.msra.mxu0 %v1704_v61  ;;  %1573 = vmatprep.mubr.msk.bf16.mxu0 %vm352_vm1, %v851_v41  ;;  %v264_v61 = vld [vmem:[%s1805_s27 + $0x4c] sm:$0x1]  ;;  %v750_v33 = vpack.c.bf16 %v1890_v21, %v1887_v20  ;;  %v1120_v39 = vrot.slane %v283_v63, 2 }
  0x2c   : > { %1587 = vmatprep.subr.bf16.mxu0 %v1709_v47  ;;  %v284_v0 = vunpack.c.l.bf16 %v264_v61  ;;  %v744_v11 = vsel %vm307_vm0, %v742_v10, %v743_v12 }
  0x2d   : > { %1530 = vmatmul.mubr.msk.bf16.vlgmr.msra.gmra.mrb[0].mxu1 %vm352_vm1, %v1399_v46  ;;  %v751_v17 = vpack.c.bf16 %v744_v11, %v1904_v25 }
  0x2e   : > { %1538 = vmatpush3.bf16.msra.mxu1 %v1863_v52  ;;  %1533 = vmatprep.mubr.msk.bf16.mxu1 %vm352_vm1, %v1400_v48  ;;  %v549_v52 = vpack.c.bf16 %v525_v31, %v1879_v7  ;;  %v1031_v7 = vrot.slane %v283_v63, 1  ;;  %v1032_v13 = vrot.slane %v284_v0, 1 }
  0x2f   : > { %1547 = vmatprep.subr.bf16.mxu1 %v1710_v53 }
  0x32   : > { %1574 = vmatmul.mubr.msk.bf16.gmra.mrb[4].mxu0 %vm352_vm1, %v852_v4 }
  0x33   : > { %1579 = vmatprep.mubr.msk.bf16.mxu0 %vm352_vm1, %v1399_v46 }
  0x35   : > { %1534 = vmatmul.mubr.msk.bf16.gmra.mrb[4].mxu1 %vm352_vm1, %v1401_v8 }
  0x36   : > { %1539 = vmatprep.mubr.msk.bf16.mxu1 %vm352_vm1, %v548_v9 }
  0x3a   : > { %1580 = vmatmul.mubr.msk.bf16.vlgmr.msra.gmra.mrb[0].mxu0 %vm352_vm1, %v1400_v48 }
  0x3b   : > { %1588 = vmatpush3.bf16.msra.mxu0 %v1709_v47  ;;  %1583 = vmatprep.mubr.msk.bf16.mxu0 %vm352_vm1, %v1401_v8 }
  0x3c   : > { %1597 = vmatprep.subr.bf16.mxu0 %v1712_v56 }
  0x3d   : > { %1540 = vmatmul.mubr.msk.bf16.vlgmr.msra.gmra.mrb[0].mxu1 %vm352_vm1, %v549_v52 }
  0x3e   : > { %1548 = vmatpush3.bf16.msra.mxu1 %v1710_v53  ;;  %1543 = vmatprep.mubr.msk.bf16.mxu1 %vm352_vm1, %v550_v57 }
  0x3f   : > { %1607 = vmatprep.subr.bf16.mxu1 %v1784_v1 }
  0x42   : > { %1584 = vmatmul.mubr.msk.bf16.gmra.mrb[4].mxu0 %vm352_vm1, %v1436_v59 }
  0x43   : > { %1589 = vmatprep.mubr.msk.bf16.mxu0 %vm352_vm1, %v1857_v49  ;;  %v1033_v49 = vsel %vm307_vm0, %v1031_v7, %v1032_v13 }
  0x44   : > { %v1037_v14 = vpack.c.bf16 %v1033_v49, %v744_v11 }
  0x45   : > { %1544 = vmatmul.mubr.msk.bf16.gmra.mrb[4].mxu1 %vm352_vm1, %v551_v60 }
  0x46   : > { %1549 = vmatprep.mubr.msk.bf16.mxu1 %vm352_vm1, %v1417_v62 }
  0x4a   : > { %1590 = vmatmul.mubr.msk.bf16.vlgmr.msra.gmra.mrb[0].mxu0 %vm352_vm1, %v1901_v3 }
  0x4b   : > { %1598 = vmatpush3.bf16.msra.mxu0 %v1712_v56  ;;  %1593 = vmatprep.mubr.msk.bf16.mxu0 %vm352_vm1, %v1909_v28 }
  0x4d   : > { %1550 = vmatmul.mubr.msk.bf16.vlgmr.msra.gmra.mrb[0].mxu1 %vm352_vm1, %v1418_v15 }
  0x4e   : > { %1608 = vmatpush3.bf16.msra.mxu1 %v1784_v1  ;;  %1553 = vmatprep.mubr.msk.bf16.mxu1 %vm352_vm1, %v1419_v6  ;;  %v1121_v1 = vrot.slane %v284_v0, 2 }
  0x50   : > { %v1122_v43 = vsel %vm513_vm2, %v1120_v39, %v1121_v1 }
  0x51   : > { %v1126_v2 = vpack.c.bf16 %v1122_v43, %v1940_v55 }
  0x52   : > { %1594 = vmatmul.mubr.msk.bf16.gmra.mrb[4].mxu0 %vm352_vm1, %v1037_v14 }
  0x53   : > { %1599 = vmatprep.mubr.msk.bf16.mxu0 %vm352_vm1, %v549_v52 }
  0x55   : > { %1554 = vmatmul.mubr.msk.bf16.gmra.mrb[4].mxu1 %vm352_vm1, %v1420_v16 }
  0x56   : > { %1563 = vmatprep.mubr.msk.bf16.mxu1 %vm352_vm1, %v750_v33 }
  0x5a   : > { %1600 = vmatmul.mubr.msk.bf16.vlgmr.msra.gmra.mrb[0].mxu0 %vm352_vm1, %v550_v57 }
  0x5b   : > { %1603 = vmatprep.mubr.msk.bf16.mxu0 %vm352_vm1, %v551_v60 }
  0x61   : > { %1564 = vmatmul.mubr.msk.bf16.vlgmr.msra.gmra.mrb[4].mxu1 %vm352_vm1, %v751_v17 }
  0x62   : > { %1604 = vmatmul.mubr.msk.bf16.gmra.mrb[4].mxu0 %vm352_vm1, %v1126_v2 }
 0x120   : > { %v1551_v18 = vpop.f32.mrb[0].mxu1 }
 0x121   : > { %v701_v19 = vpop.f32.mrb[1].mxu1 }
 0x122   : > { %v1552_v20 = vpop.f32.mrb[2].mxu1 }
 0x123   : > { %v704_v21 = vpop.f32.mrb[3].mxu1 }
 0x12d   : > { %v1601_v22 = vpop.f32.mrb[0].mxu0 }
 0x12e   : > { %v1609_v24 = vadd.f32 %v1601_v22, %v1551_v18  ;;  %v1170_v3 = vpop.f32.mrb[1].mxu0 }
 0x12f   : > { %v1610_v26 = vadd.f32 %v1170_v3, %v701_v19  ;;  %v1602_v25 = vpop.f32.mrb[2].mxu0 }
 0x130   : > { %v1218_v27 = vadd.f32 %v1609_v24, %v1452_v23  ;;  %v1611_v28 = vadd.f32 %v1602_v25, %v1552_v20  ;;  %v1173_v29 = vpop.f32.mrb[3].mxu0 }
 0x131   : > { %v1216_v30 = vadd.f32 %v1610_v26, %v1452_v23  ;;  %v1612_v31 = vadd.f32 %v1173_v29, %v704_v21 }
 0x132   : > { %v1466_v32 = vpack.c.bf16 %v1218_v27, %v1218_v27  ;;  %v1219_v34 = vadd.f32 %v1611_v28, %v1452_v23 }
 0x133   : > { %v1464_v35 = vpack.c.bf16 %v1216_v30, %v1216_v30  ;;  %v1217_v36 = vadd.f32 %v1612_v31, %v1452_v23 }
 0x134   : > { %v1565_v37 = vpop.f32.mrb[4].mxu1  ;;  %1259 = vst.msk [vmem:[%s2008_s20 + $0x8] sm:$0xf] %vm1256_vm3, %v1466_v32  ;;  %v1467_v38 = vpack.c.bf16 %v1219_v34, %v1219_v34 }
 0x135   : > { %v820_v40 = vpop.f32.mrb[5].mxu1  ;;  %1257 = vst.msk [vmem:[%s2008_s20] sm:$0xf] %vm1256_vm3, %v1464_v35  ;;  %v1465_v41 = vpack.c.bf16 %v1217_v36, %v1217_v36  ;;  %v1605_v42 = vpop.f32.mrb[4].mxu0 }
 0x136   : > { %v1566_v44 = vpop.f32.mrb[6].mxu1  ;;  %1260 = vst.msk [vmem:[%s2008_s20 + $0xc] sm:$0xf] %vm1256_vm3, %v1467_v38  ;;  %v1613_v45 = vadd.f32 %v1605_v42, %v1565_v37  ;;  %v1186_v46 = vpop.f32.mrb[5].mxu0 }
 0x137   : > { %v823_v47 = vpop.f32.mrb[7].mxu1  ;;  %1258 = vst.msk [vmem:[%s2008_s20 + $0x4] sm:$0xf] %vm1256_vm3, %v1465_v41  ;;  %v1614_v48 = vadd.f32 %v1186_v46, %v820_v40  ;;  %v1606_v50 = vpop.f32.mrb[6].mxu0 }
 0x138   : > { %v1222_v51 = vadd.f32 %v1613_v45, %v1452_v23  ;;  %v1615_v53 = vadd.f32 %v1606_v50, %v1566_v44  ;;  %v1189_v54 = vpop.f32.mrb[7].mxu0 }
 0x139   : > { %v1220_v55 = vadd.f32 %v1614_v48, %v1452_v23  ;;  %v1616_v4 = vadd.f32 %v1189_v54, %v823_v47 }
 0x13a   : > { %v1470_v5 = vpack.c.bf16 %v1222_v51, %v1222_v51  ;;  %v1223_v8 = vadd.f32 %v1615_v53, %v1452_v23 }
 0x13b   : > { %v1468_v9 = vpack.c.bf16 %v1220_v55, %v1220_v55  ;;  %v1221_v52 = vadd.f32 %v1616_v4, %v1452_v23 }
 0x13c   : > { %1263 = vst.msk [vmem:[%s2008_s20 + $0x18] sm:$0xf] %vm1256_vm3, %v1470_v5  ;;  %v1471_v56 = vpack.c.bf16 %v1223_v8, %v1223_v8 }
 0x13d   : > { %1261 = vst.msk [vmem:[%s2008_s20 + $0x10] sm:$0xf] %vm1256_vm3, %v1468_v9  ;;  %v1469_v57 = vpack.c.bf16 %v1221_v52, %v1221_v52 }
 0x13e   : > { %1264 = vst.msk [vmem:[%s2008_s20 + $0x1c] sm:$0xf] %vm1256_vm3, %v1471_v56 }
 0x13f   : > { %1262 = vst.msk [vmem:[%s2008_s20 + $0x14] sm:$0xf] %vm1256_vm3, %v1469_v57 }
 0x140 PF: > { %s13_s14 = sadd.s32 1, %s1738_s14   ;;  %s2039_s12 = smov %s1734_s13 }
 0x141   : > { %p10_p5 = scmp.ge.s32.totalorder %s13_s14, 4   ;;  %s2040_s13 = smov %s2042_s15 }
 0x143   :  { %12 = sbr.rel (!%p10_p5) target bundleno = 2 (0x2), region = 69 }

</bundles_post_ra>
